<compile_context>
chip_gen: v7x
topology: tpu7x:2x2x1
jax: 0.10.0
libtpu: 0.0.40
codegen_flags: <defaults>
</compile_context>

<pallas_src>
import functools

import jax
import jax.numpy as jnp
from jax import lax
from jax.experimental import pallas as pl
from jax.experimental.pallas import tpu as pltpu


def _layernorm2d_kernel(x_ref, w_ref, b_ref, o_ref, *, eps: float, inv_c: float):
    # x_ref: (1, C, TILE_HW) block; w_ref/b_ref: (1, C, 1)
    x = x_ref[...].astype(jnp.float32)

    # Fused single-sweep statistics over the channel (sublane) axis.
    s1 = jnp.sum(x, axis=1, keepdims=True)          # (1, 1, T)
    s2 = jnp.sum(x * x, axis=1, keepdims=True)      # (1, 1, T)
    mean = s1 * inv_c
    var = s2 * inv_c - mean * mean                  # biased variance (matches PyTorch)
    inv = lax.rsqrt(var + eps)                      # EUP rsqrt

    y = (x - mean) * inv
    w = w_ref[...].astype(jnp.float32)              # broadcast over lanes
    b = b_ref[...].astype(jnp.float32)
    o_ref[...] = (w * y + b).astype(o_ref.dtype)


def _pick_tile_hw(C: int, HW: int, itemsize: int,
                  max_tile: int = 2048, vmem_budget: int = 24 << 20) -> int:
    """Largest lane tile that (double-buffered in+out) fits the VMEM budget."""
    if HW <= 128:
        return HW
    # ~4 resident blocks: 2x double-buffered input + 2x double-buffered output.
    max_lanes = max(128, vmem_budget // (4 * C * itemsize))
    t = min(HW, max_tile, max_lanes)
    t = max(128, (t // 128) * 128)   # keep lane tile a multiple of 128
    if t >= HW:
        return HW
    return t


def layernorm2d(x_nchw: jax.Array, weight: jax.Array, bias: jax.Array,
                eps: float = 1e-6, tile_hw: int | None = None) -> jax.Array:
    """x_nchw: (N, C, H, W); weight/bias: (C,). Returns (N, C, H, W)."""
    N, C, H, W = x_nchw.shape
    HW = H * W
    itemsize = jnp.dtype(x_nchw.dtype).itemsize

    if tile_hw is None:
        tile_hw = _pick_tile_hw(C, HW, itemsize)

    # Free, contiguous reshapes (no device transpose).
    x3d = x_nchw.reshape(N, C, HW)
    w3d = weight.reshape(1, C, 1)
    b3d = bias.reshape(1, C, 1)

    grid = (N, pl.cdiv(HW, tile_hw))

    kernel = functools.partial(_layernorm2d_kernel, eps=eps, inv_c=1.0 / C)

    cost = pl.CostEstimate(
        flops=7 * N * C * HW,
        transcendentals=N * HW,
        bytes_accessed=2 * N * C * HW * itemsize + 2 * C * 4,
    )

    out3d = pl.pallas_call(
        kernel,
        out_shape=jax.ShapeDtypeStruct((N, C, HW), x_nchw.dtype),
        grid_spec=pltpu.PrefetchScalarGridSpec(
            num_scalar_prefetch=0,
            grid=grid,
            in_specs=[
                pl.BlockSpec((1, C, tile_hw), lambda n, t: (n, 0, t)),
                pl.BlockSpec((1, C, 1), lambda n, t: (0, 0, 0)),
                pl.BlockSpec((1, C, 1), lambda n, t: (0, 0, 0)),
            ],
            out_specs=pl.BlockSpec((1, C, tile_hw), lambda n, t: (n, 0, t)),
        ),
        compiler_params=pltpu.CompilerParams(
            dimension_semantics=("parallel", "parallel"),
            vmem_limit_bytes=64 << 20,
        ),
        cost_estimate=cost,
    )(x3d, w3d, b3d)

    return out3d.reshape(N, C, H, W)


def _reference(x_nchw, weight, bias, eps=1e-6):
    u = jnp.mean(x_nchw, axis=1, keepdims=True)
    s = jnp.mean((x_nchw - u) ** 2, axis=1, keepdims=True)
    xn = (x_nchw - u) / jnp.sqrt(s + eps)
    return weight[None, :, None, None] * xn + bias[None, :, None, None]


if __name__ == "__main__":
    key = jax.random.PRNGKey(0)
    N, C, H, W = 2, 4, 16, 16

    kx, _ = jax.random.split(key)
    x = jax.random.normal(kx, (N, C, H, W), dtype=jnp.float32)

    # Deterministic parameter init, matching nn.Parameter(ones)/nn.Parameter(zeros).
    weight = jnp.ones((C,), dtype=jnp.float32)
    bias = jnp.zeros((C,), dtype=jnp.float32)

    out = layernorm2d(x, weight, bias, eps=1e-6)
    out = jax.block_until_ready(out)

    ref = _reference(x, weight, bias, eps=1e-6)
    assert out.shape == (N, C, H, W)
    assert jnp.allclose(out, ref, atol=1e-5, rtol=1e-5), "mismatch vs reference"

    print("KERNEL_OK")
</pallas_src>

<mosaic_0001>
module attributes {stable_mosaic.version = 11 : i64} {
  func.func @_layernorm2d_kernel(%arg0: i32, %arg1: i32, %arg2: memref<1x4x256xf32, #tpu.memory_space<vmem>>, %arg3: memref<1x4x1xf32, #tpu.memory_space<vmem>>, %arg4: memref<1x4x1xf32, #tpu.memory_space<vmem>>, %arg5: memref<1x4x256xf32, #tpu.memory_space<vmem>>) attributes {dimension_semantics = [#tpu.dimension_semantics<parallel>, #tpu.dimension_semantics<parallel>], iteration_bounds = array<i64: 2, 1>, scalar_prefetch = 0 : i64, scratch_operands = 0 : i64, tpu.core_type = #tpu.core_type<tc>, window_params = [{transform_indices = @transform_0, window_bounds = array<i64: 1, 4, 256>}, {pipeline_mode = #tpu.pipeline_mode<synchronous>, transform_indices = @transform_1, window_bounds = array<i64: 1, 4, 1>}, {pipeline_mode = #tpu.pipeline_mode<synchronous>, transform_indices = @transform_2, window_bounds = array<i64: 1, 4, 1>}, {transform_indices = @transform_3, window_bounds = array<i64: 1, 4, 256>}]} {
    %c0 = arith.constant 0 : index
    %c0_0 = arith.constant 0 : index
    %c0_1 = arith.constant 0 : index
    %0 = vector.load %arg2[%c0, %c0_0, %c0_1] : memref<1x4x256xf32, #tpu.memory_space<vmem>>, vector<1x4x256xf32>
    %cst = arith.constant dense<0.000000e+00> : vector<1x256xf32>
    %1 = vector.multi_reduction <add>, %0, %cst [1] : vector<1x4x256xf32> to vector<1x256xf32>
    %2 = vector.shape_cast %1 : vector<1x256xf32> to vector<1x1x256xf32>
    %3 = arith.mulf %0, %0 : vector<1x4x256xf32>
    %cst_2 = arith.constant dense<0.000000e+00> : vector<1x256xf32>
    %4 = vector.multi_reduction <add>, %3, %cst_2 [1] : vector<1x4x256xf32> to vector<1x256xf32>
    %5 = vector.shape_cast %4 : vector<1x256xf32> to vector<1x1x256xf32>
    %cst_3 = arith.constant 2.500000e-01 : f32
    %6 = vector.broadcast %cst_3 : f32 to vector<1x1x256xf32>
    %7 = arith.mulf %2, %6 : vector<1x1x256xf32>
    %cst_4 = arith.constant 2.500000e-01 : f32
    %8 = vector.broadcast %cst_4 : f32 to vector<1x1x256xf32>
    %9 = arith.mulf %5, %8 : vector<1x1x256xf32>
    %10 = arith.mulf %7, %7 : vector<1x1x256xf32>
    %11 = arith.subf %9, %10 : vector<1x1x256xf32>
    %cst_5 = arith.constant 9.99999997E-7 : f32
    %12 = vector.broadcast %cst_5 : f32 to vector<1x1x256xf32>
    %13 = arith.addf %11, %12 : vector<1x1x256xf32>
    %14 = math.rsqrt %13 : vector<1x1x256xf32>
    %15 = vector.broadcast %7 : vector<1x1x256xf32> to vector<1x4x256xf32>
    %16 = arith.subf %0, %15 : vector<1x4x256xf32>
    %17 = vector.broadcast %14 : vector<1x1x256xf32> to vector<1x4x256xf32>
    %18 = arith.mulf %16, %17 : vector<1x4x256xf32>
    %c0_6 = arith.constant 0 : index
    %c0_7 = arith.constant 0 : index
    %c0_8 = arith.constant 0 : index
    %19 = vector.load %arg3[%c0_6, %c0_7, %c0_8] : memref<1x4x1xf32, #tpu.memory_space<vmem>>, vector<1x4x1xf32>
    %c0_9 = arith.constant 0 : index
    %c0_10 = arith.constant 0 : index
    %c0_11 = arith.constant 0 : index
    %20 = vector.load %arg4[%c0_9, %c0_10, %c0_11] : memref<1x4x1xf32, #tpu.memory_space<vmem>>, vector<1x4x1xf32>
    %21 = vector.broadcast %19 : vector<1x4x1xf32> to vector<1x4x256xf32>
    %22 = arith.mulf %21, %18 : vector<1x4x256xf32>
    %23 = vector.broadcast %20 : vector<1x4x1xf32> to vector<1x4x256xf32>
    %24 = arith.addf %22, %23 : vector<1x4x256xf32>
    %c0_12 = arith.constant 0 : index
    %c0_13 = arith.constant 0 : index
    %c0_14 = arith.constant 0 : index
    %25 = vector.load %arg5[%c0_12, %c0_13, %c0_14] : memref<1x4x256xf32, #tpu.memory_space<vmem>>, vector<1x4x256xf32>
    tpu.vector_store %arg5[%c0_12, %c0_13, %c0_14], %24 {strides = array<i32>} : memref<1x4x256xf32, #tpu.memory_space<vmem>>, vector<1x4x256xf32>,
    return
  }
  func.func @transform_0(%arg0: i32, %arg1: i32) -> (i32, i32, i32) {
    %c0_i32 = arith.constant 0 : i32
    %c0_i32_0 = arith.constant 0 : i32
    return %arg0, %c0_i32, %arg1 : i32, i32, i32
  }
  func.func @transform_1(%arg0: i32, %arg1: i32) -> (i32, i32, i32) {
    %c0_i32 = arith.constant 0 : i32
    %c0_i32_0 = arith.constant 0 : i32
    %c0_i32_1 = arith.constant 0 : i32
    %c0_i32_2 = arith.constant 0 : i32
    return %c0_i32, %c0_i32_0, %c0_i32_1 : i32, i32, i32
  }
  func.func @transform_2(%arg0: i32, %arg1: i32) -> (i32, i32, i32) {
    %c0_i32 = arith.constant 0 : i32
    %c0_i32_0 = arith.constant 0 : i32
    %c0_i32_1 = arith.constant 0 : i32
    %c0_i32_2 = arith.constant 0 : i32
    return %c0_i32, %c0_i32_0, %c0_i32_1 : i32, i32, i32
  }
  func.func @transform_3(%arg0: i32, %arg1: i32) -> (i32, i32, i32) {
    %c0_i32 = arith.constant 0 : i32
    %c0_i32_0 = arith.constant 0 : i32
    return %arg0, %c0_i32, %arg1 : i32, i32, i32
  }
}

</mosaic_0001>

<bundles_post_ra>
// kernel: tpu_custom_call.1
= control target key start
LH: loop header
LB: loop body
LE: loop exit
PB: predicated region body
PF: predicated region fallthrough
CT: control target
= control target key end

     0   :  { %8 = vsyncpa [#allocation3], 0  ;;  %s992_s0 = inlined_call_operand.hbm [shape: f32[2,4,256], index: 0, kind: input, shape index: {}]   ;;  %s993_s1 = inlined_call_operand.hbm [shape: f32[1,4,1], index: 1, kind: input, shape index: {}]   ;;  %s994_s2 = inlined_call_operand.hbm [shape: f32[1,4,1], index: 2, kind: input, shape index: {}]   ;;  %s995_s3 = inlined_call_operand.hbm [shape: f32[2,4,256], index: 3, kind: output, shape index: {}]  }
   0x1   :  { %10 = vsyncpa [#allocation3 + $0x1], 0 }
   0x2   :  { %11 = vsyncpa [#allocation6], 0 }
   0x3   :  { %12 = vsyncpa [#allocation4], 0 }
   0x4   :  { %14 = vsyncpa [#allocation4 + $0x1], 0  ;;  %s745_s12 = smov 0   ;;  %s747_s13 = smov 0  }
   0x5   :  { %s749_s14 = smov 0   ;;  %s751_s15 = smov 0  }
   0x6   :  { %s753_s16 = smov 0   ;;  %s755_s17 = smov 0  }
   0x7 LB: > { %s435_s18 = sadd.s32 4294967295, %s718_s17   ;;  %s436_s19 = sadd.s32 4294967294, %s718_s17   ;;  %s718_s17 = sphi %s755_s17, %s20_s17   ;;  %s714_s16 = sphi %s753_s16, %s1018_s16   ;;  %s710_s15 = sphi %s751_s15, %s1017_s15   ;;  %s706_s14 = sphi %s749_s14, %s1016_s14   ;;  %s702_s13 = sphi %s747_s13, %s1015_s13   ;;  %s698_s12 = sphi %s745_s12, %s1014_s12  }
   0x8   : > { %p54_p0 = scmp.ne.s32.totalorder %s702_s13, %s698_s12  ;;  %p779_p1 = scmp.eq.s32.totalorder %s435_s18, 0 }
   0x9   : > { %p783_p2 = scmp.eq.s32.totalorder %s435_s18, 1  ;;  %p128_p3 = scmp.eq.s32.totalorder %s436_s19, 1 }
   0xa   : > { %s1000_s20 = scalar_select %p779_p1, 1, 0 }
   0xb   : > { %s1001_s21 = scalar_select %p783_p2, 1, 0 }
   0xc   : > { %p789_p4 = por %p779_p1, %p54_p0  ;;  %p437_p5 = scmp.ge.s32.totalorder %s718_s17, 1 }
   0xd   : > { %p794_p6 = por %p128_p3, %p54_p0  ;;  %p135_p7 = scmp.lt.s32.totalorder %s718_s17, 3 }
   0xe   : > { %s1002_s22 = scalar_select %p789_p4, 1, 0 }
   0xf   : > { %s1003_s23 = scalar_select %p794_p6, 1, 0 }
  0x10   : > { %p799_p8 = pnand %p437_p5, %p135_p7  ;;  %s720_s25 = smov [#allocation5]  }
  0x11   : > { %s148_s26 = sshll.u32 %s720_s25, 4  ;;  %s721_s27 = smov [#allocation7]   ;;  %s149_s26 = int_to_ptr.vmem [resolvable:$true] %s148_s26 }
  0x12   : > { %s1004_s24 = scalar_select %p799_p8, 1, 0 }
  0x13   : > { %p468_p10 = pneg %p799_p8  ;;  %s159_s28 = sshll.u32 %s721_s27, 4  ;;  %s812_s28 = int_to_ptr.vmem [resolvable:$true] %s159_s28 }
  0x14   : > { %s546_s5 = scalar_lea.hbm %s993_s1, 64 }
  0x15   : > { %p808_p11 = pnand %p468_p10, %p779_p1  ;;  %p547_p12 = scmp.ne.s32.totalorder %s993_s1, %s546_s5 }
  0x16   : > { %p553_p5 = scmp.lt.u32.totalorder %s546_s5, %s993_s1 }
  0x17   : > { %p548_p13 = pneg %p808_p11 }
  0x19   : > { %p549_p0 = pnand %p548_p13, %p547_p12 }
  0x1b   : > { %p550_p3 = pneg %p549_p0 }
  0x1d   : > { %p555_p7 = pnand %p553_p5, %p550_p3 }
  0x1f   : > { %558 = shalt.err (!%p555_p7)
}
  0x20   : > { %s559_s10 = scalar_lea.vmem %s149_s26, 64  ;;  %p567_p1 = scmp.lt.s32.totalorder %s149_s26, %s149_s26 }
  0x21   : > { %p560_p10 = scmp.ne.s32.totalorder %s149_s26, %s559_s10  ;;  %p568_p4 = scmp.lt.s32.totalorder %s559_s10, %s559_s10 }
  0x23   : > { %p562_p9 = pnand %p560_p10, %p548_p13  ;;  %p569_p8 = por %p568_p4, %p567_p1 }
  0x25   : > { %p563_p6 = pneg %p562_p9 }
  0x27   : > { %p570_p2 = pnand %p569_p8, %p563_p6 }
  0x29   : > { %573 = shalt.err (!%p570_p2)
}
  0x2a   : > { %471 = dma.hbm_to_vmem [thread:$0]  (!%p808_p11), %s993_s1, 64, %s149_s26, [#allocation6]  }
  0x2b   : > { %s574_s27 = scalar_lea.hbm %s994_s2, 64 }
  0x2c   : > { %p575_p9 = scmp.ne.s32.totalorder %s994_s2, %s574_s27  ;;  %p581_p2 = scmp.lt.u32.totalorder %s574_s27, %s994_s2 }
  0x2e   : > { %p577_p1 = pnand %p575_p9, %p548_p13 }
  0x30   : > { %p578_p4 = pneg %p577_p1 }
  0x32   : > { %p583_p6 = pnand %p581_p2, %p578_p4 }
  0x34   : > { %586 = shalt.err (!%p583_p6)
}
  0x35   : > { %s587_s26 = scalar_lea.vmem %s812_s28, 64  ;;  %p595_p3 = scmp.lt.s32.totalorder %s812_s28, %s812_s28 }
  0x36   : > { %p588_p8 = scmp.ne.s32.totalorder %s812_s28, %s587_s26  ;;  %p596_p5 = scmp.lt.s32.totalorder %s587_s26, %s587_s26 }
  0x38   : > { %p590_p12 = pnand %p588_p8, %p548_p13  ;;  %p597_p7 = por %p596_p5, %p595_p3 }
  0x3a   : > { %p591_p0 = pneg %p590_p12 }
  0x3c   : > { %p598_p10 = pnand %p597_p7, %p591_p0 }
  0x3e   : > { %601 = shalt.err (!%p598_p10)
}
  0x3f   : > { %474 = dma.hbm_to_vmem [thread:$0]  (!%p808_p11), %s994_s2, 64, %s812_s28, [#allocation6]  }
  0x40   : > { %s32_s9 = sadd.s32 1, %s714_s16  ;;  %s41_s10 = sadd.s32 1, %s706_s14 }
  0x41   : > { %p34_p13 = scmp.ge.s32.totalorder %s32_s9, 2  ;;  %p48_p9 = scmp.ne.s32.totalorder %s706_s14, %s702_s13 }
  0x42   : > { %p49_p1 = scmp.eq.s32.totalorder %s718_s17, 0  ;;  %p485_p4 = scmp.lt.s32.totalorder %s718_s17, 2 }
  0x43   : > { %s1020_s9 = smov (%p34_p13, %s32_s9), 0  ;;  %p1006_p6 = scmp.ne.s32.totalorder %s1001_s21, 0 }
  0x44   : > { %p50_p2 = por %p49_p1, %p48_p9  ;;  %s36_s11 = ssub.s32 %s714_s16, %s1020_s9 }
  0x45   : > { %p871_p8 = por %p1006_p6, %p48_p9  ;;  %s170_s18 = sand.u32 1, %s706_s14  }
  0x46   : > { %p39_p12 = scmp.eq.s32.totalorder %s36_s11, 0  ;;  %s441_s28 = sshll.u32 %s170_s18, 3 }
  0x47   : > { %s454_s19 = sshll.u32 %s714_s16, 7  ;;  %s174_s21 = scalar_lea.vmem [#allocation2], %s441_s28 }
  0x48   : > { %s880_s25 = scalar_select %p39_p12, %s706_s14, %s41_s10  }
  0x49   : > { %s885_s4 = scalar_lea.hbm %s992_s0, %s454_s19  ;;  %s184_s5 = sshll.u32 %s174_s21, 4  ;;  %s893_s5 = int_to_ptr.vmem [resolvable:$true] %s184_s5 }
  0x4a   : > { %p889_p11 = pnand %p485_p4, %p50_p2  ;;  %s171_s26 = scalar_lea.sflag [#allocation3], %s170_s18 }
  0x4b   : > { %s602_s7 = scalar_lea.hbm %s885_s4, 128  ;;  %s607_s11 = scalar_lea.hbm %s992_s0, 256 }
  0x4c   : > { %p603_p0 = scmp.ne.s32.totalorder %s885_s4, %s602_s7  ;;  %p604_p3 = pneg %p889_p11 }
  0x4d   : > { %p608_p10 = scmp.lt.u32.totalorder %s885_s4, %s992_s0  ;;  %p609_p13 = scmp.lt.u32.totalorder %s607_s11, %s602_s7 }
  0x4e   : > { %p605_p5 = pnand %p604_p3, %p603_p0  ;;  %p611_p1 = scmp.lt.u32.totalorder %s602_s7, %s885_s4 }
  0x4f   : > { %p610_p9 = por %p609_p13, %p608_p10 }
  0x50   : > { %p606_p7 = pneg %p605_p5 }
  0x51   : > { %p612_p4 = por %p611_p1, %p610_p9 }
  0x53   : > { %p613_p2 = pnand %p612_p4, %p606_p7 }
  0x55   : > { %616 = shalt.err (!%p613_p2)
}
  0x56   : > { %s617_s18 = scalar_lea.vmem %s893_s5, 128  ;;  %s722_s27 = smov [#allocation2]  }
  0x57   : > { %p618_p6 = scmp.ne.s32.totalorder %s893_s5, %s617_s18  ;;  %s622_s30 = sshll.u32 %s722_s27, 4  ;;  %s623_s30 = int_to_ptr.vmem [resolvable:$false] %s622_s30 }
  0x58   : > { %s624_s21 = scalar_lea.vmem %s623_s30, 256  ;;  %p625_p5 = scmp.lt.s32.totalorder %s893_s5, %s623_s30 }
  0x59   : > { %p620_p12 = pnand %p618_p6, %p604_p3  ;;  %p626_p10 = scmp.lt.s32.totalorder %s624_s21, %s617_s18 }
  0x5b   : > { %p621_p0 = pneg %p620_p12  ;;  %p627_p13 = por %p626_p10, %p625_p5 }
  0x5d   : > { %p628_p9 = pnand %p627_p13, %p621_p0 }
  0x5f   : > { %631 = shalt.err (!%p628_p9)
}
  0x60   : > { %478 = dma.hbm_to_vmem [thread:$0]  (!%p889_p11), %s885_s4, 128, %s893_s5, %s171_s26  }
  0x61   : > { %p1009_p7 = scmp.ne.s32.totalorder %s1004_s24, 0 }
  0x62   : > { %s923_s7 = sand.u32 (!%p1009_p7), 1, %s702_s13   ;;  %p1010_p3 = scmp.ne.s32.totalorder (!%p1009_p7), %s1002_s22, 0 }
  0x63   : > { %193 = sbr.rel (%p1009_p7) target bundleno = 262 (0x106), region = 32  ;;  %s445_s8 = sshll.u32 (!%p1009_p7), %s923_s7, 3 }
  0x64   : > { %s196_s10 = scalar_lea.sflag (!%p1009_p7), [#allocation3], %s923_s7  ;;  %s199_s11 = scalar_lea.vmem (!%p1009_p7), [#allocation2], %s445_s8 }
  0x6a   : > { %685 = dma.done.wait (%p1010_p3), %s196_s10, 128  }
  0x6b   : > { %687 = vsyncadd (%p1010_p3), %s196_s10, 4294967168  ;;  %p1011_p11 = scmp.ne.s32.totalorder %s1000_s20, 0 }
  0x6d   : > { %689 = dma.done.wait (%p1011_p11), [#allocation6], 128  }
  0x6e   : > { %691 = vsyncadd (%p1011_p11), [#allocation6], 4294967168  ;;  %v723_v0 = vmov 0   ;;  %v291_v1 = vld [vmem:[#allocation5] sm:$0xf]  ;;  %v232_v3 = vld [vmem:[%s199_s11] sm:$0xff] }
  0x6f   : > { %540 = vset.pattern.permute.xlu0 %v723_v0  ;;  %v292_v2 = vld [vmem:[#allocation7] sm:$0xf]  ;;  %vm236_vm0 = vcmask 1043456   ;;  %v234_v4 = vcombine.high %v232_v3, %v232_v3  ;;  %v251_v5 = vmul.f32 %v232_v3, %v232_v3  ;;  %s455_s20 = sshll.u32 %s710_s15, 7  ;;  %s229_s22 = scalar_lea.vmem [#allocation8], %s445_s8 }
  0x70   : > { %295 = vperm.xlu0 %540, %v291_v1   ;;  %v237_v6 = vsel %vm236_vm0, %v232_v3, 0.0  ;;  %s332_s24 = sshll.u32 %s229_s22, 4  ;;  %s943_s6 = scalar_lea.hbm %s995_s3, %s455_s20  ;;  %s945_s24 = int_to_ptr.vmem [resolvable:$true] %s332_s24 }
  0x71   : > { %v244_v7 = vsel %vm236_vm0, %v234_v4, 0.0  ;;  %v253_v8 = vcombine.high %v251_v5, %v251_v5  ;;  %v238_v9 = vrot.slane %v237_v6, 4  ;;  %v255_v11 = vsel %vm236_vm0, %v251_v5, 0.0  ;;  %s316_s26 = scalar_lea.sflag [#allocation4], %s923_s7  ;;  %s632_s28 = scalar_lea.vmem %s945_s24, 128 }
  0x72   : > { %v245_v10 = vrot.slane %v244_v7, 4  ;;  %v256_v14 = vrot.slane %v255_v11, 4  ;;  %p633_p1 = scmp.ne.s32.totalorder %s945_s24, %s632_s28  ;;  %s724_s15 = smov [#allocation8]  }
  0x73   : > { %v262_v12 = vsel %vm236_vm0, %v253_v8, 0.0  ;;  %v239_v13 = vadd.f32 %v238_v9, %v237_v6  ;;  %s636_s19 = sshll.u32 %s724_s15, 4  ;;  %s637_s19 = int_to_ptr.vmem [resolvable:$false] %s636_s19 }
  0x74   : > { %305 = vperm.xlu0 %540, %v292_v2   ;;  %v246_v15 = vadd.f32 %v245_v10, %v244_v7  ;;  %v263_v16 = vrot.slane %v262_v12, 4  ;;  %v257_v18 = vadd.f32 %v256_v14, %v255_v11  ;;  %p634_p4 = pnand %p633_p1, %p871_p8  ;;  %s638_s18 = scalar_lea.vmem %s637_s19, 256 }
  0x75   : > { %v240_v17 = vrot.slane %v239_v13, 2  ;;  %p639_p6 = scmp.lt.s32.totalorder %s945_s24, %s637_s19  ;;  %p640_p12 = scmp.lt.s32.totalorder %s638_s18, %s632_s28 }
  0x76   : > { %v247_v19 = vrot.slane %v246_v15, 2  ;;  %v264_v20 = vadd.f32 %v263_v16, %v262_v12  ;;  %v258_v22 = vrot.slane %v257_v18, 2  ;;  %p635_p2 = pneg %p634_p4 }
  0x77   : > { %v241_v21 = vadd.f32 %v240_v17, %v239_v13  ;;  %p641_p0 = por %p640_p12, %p639_p6 }
  0x78   : > { %v248_v23 = vadd.f32 %v247_v19, %v246_v15  ;;  %v265_v24 = vrot.slane %v264_v20, 2  ;;  %v259_v26 = vadd.f32 %v258_v22, %v257_v18 }
  0x79   : > { %v242_v25 = vrot.slane %v241_v21, 1  ;;  %p642_p5 = pnand %p641_p0, %p635_p2 }
  0x7a   : > { %v249_v27 = vrot.slane %v248_v23, 1  ;;  %v266_v28 = vadd.f32 %v265_v24, %v264_v20  ;;  %v260_v30 = vrot.slane %v259_v26, 1 }
  0x7b   : > { %v243_v29 = vadd.f32 %v242_v25, %v241_v21 }
  0x7c   : > { %v250_v31 = vadd.f32 %v249_v27, %v248_v23  ;;  %v267_v32 = vrot.slane %v266_v28, 1  ;;  %v261_v33 = vadd.f32 %v260_v30, %v259_v26 }
  0x7d   : > { %v269_v34 = vmul.f32 0.25, %v243_v29 }
  0x7e   : > { %v268_v35 = vadd.f32 %v267_v32, %v266_v28  ;;  %v270_v36 = vmul.f32 0.25, %v250_v31  ;;  %v271_v37 = vmul.f32 0.25, %v261_v33 }
  0x7f   : > { %v273_v38 = vmul.f32 %v269_v34, %v269_v34 }
  0x80   : > { %v272_v39 = vmul.f32 0.25, %v268_v35  ;;  %v274_v40 = vmul.f32 %v270_v36, %v270_v36  ;;  %v283_v46 = vcombine.low %v269_v34, %v270_v36 }
  0x81   : > { %v275_v41 = vsub.f32 %v271_v37, %v273_v38 }
  0x82   : > { %v276_v42 = vsub.f32 %v272_v39, %v274_v40  ;;  %v285_v48 = vsub.f32 %v232_v3, %v283_v46 }
  0x83   : > { %v277_v43 = vadd.f32 1e-06, %v275_v41 }
  0x84   : > { %v278_v44 = vadd.f32 1e-06, %v276_v42 }
  0x85   : > { %542 = vrsqrt.f32 %v277_v43 }
  0x86   : > { %544 = vrsqrt.f32 %v278_v44 }
  0x8f   : > { %v543_v45 = vpop.eup %542 }
  0x90   : > { %v545_v47 = vpop.eup %544 }
  0x91   : > { %v288_v49 = vcombine.low %v543_v45, %v545_v47 }
  0x93   : > { %v290_v50 = vmul.f32 %v288_v49, %v285_v48 }
  0x95   : > { %v299_v51 = vcombine.high %v290_v50, %v290_v50 }
  0xef   : > { %v296_v52 = vpop.permute.xlu0 %295 }
  0xf0   : > { %v301_v53 = vmul.f32 %v296_v52, %v290_v50  ;;  %v302_v54 = vmul.f32 %v299_v51, %v296_v52 }
  0xf3   : > { %v306_v55 = vpop.permute.xlu0 %305 }
  0xf4   : > { %v308_v56 = vadd.f32 %v306_v55, %v301_v53  ;;  %v309_v57 = vadd.f32 %v306_v55, %v302_v54 }
  0xf6   : > { %v312_v58 = vcombine.low %v308_v56, %v309_v57 }
  0xf8   : > { %314 = vst [vmem:[%s229_s22] sm:$0xff] %v312_v58 }
  0xf9   : > { %645 = shalt.err (!%p642_p5)
}
  0xfa   : > { %s646_s27 = scalar_lea.hbm %s943_s6, 128  ;;  %s650_s7 = scalar_lea.hbm %s995_s3, 256 }
  0xfb   : > { %p647_p10 = scmp.ne.s32.totalorder %s943_s6, %s646_s27  ;;  %p651_p7 = scmp.lt.u32.totalorder %s943_s6, %s995_s3 }
  0xfc   : > { %p652_p3 = scmp.lt.u32.totalorder %s650_s7, %s646_s27  ;;  %p654_p1 = scmp.lt.u32.totalorder %s646_s27, %s943_s6 }
  0xfd   : > { %p648_p13 = pnand %p647_p10, %p871_p8 }
  0xfe   : > { %p653_p11 = por %p652_p3, %p651_p7 }
  0xff   : > { %p649_p9 = pneg %p648_p13 }
 0x100   : > { %p655_p4 = por %p654_p1, %p653_p11 }
 0x102   : > { %p656_p2 = pnand %p655_p4, %p649_p9 }
 0x104   : > { %659 = shalt.err (!%p656_p2)
}
 0x105   : > { %466 = dma.vmem_to_hbm [thread:$0]  (%p871_p8), %s945_s24, 128, %s943_s6, %s316_s26  }
 0x106 PF: > { %s344_s11 = sand.u32 1, %s698_s12   ;;  %p1012_p6 = scmp.ne.s32.totalorder %s1003_s23, 0 }
 0x107   : > { %p1013_p12 = scmp.ge.s32.totalorder %s718_s17, 2  ;;  %s345_s20 = scalar_lea.sflag [#allocation4], %s344_s11 }
 0x109   : > { %p480_p0 = pnand %p1013_p12, %p1012_p6 }
 0x10b   : > { %693 = dma.done.wait (!%p480_p0), %s345_s20, 128  }
 0x10c   : > { %695 = vsyncadd (!%p480_p0), %s345_s20, 4294967168  ;;  %s20_s17 = sadd.s32 1, %s718_s17   ;;  %s1014_s12 = smov %s702_s13 }
 0x10d   : > { %p17_p5 = scmp.ge.s32.totalorder %s20_s17, 4   ;;  %s1015_s13 = smov %s706_s14 }
 0x10e   : > { %s1016_s14 = smov %s880_s25  ;;  %s1017_s15 = smov %s714_s16 }
 0x10f   : > { %s1018_s16 = smov %s1020_s9  ;;  %19 = sbr.rel (!%p17_p5) target bundleno = 7 (0x7), region = 85 }
 0x116   :  { %350 = vsyncpa [#allocation3], 1 }
 0x117   :  { %352 = vsyncpa [#allocation3 + $0x1], 1 }
 0x118   :  { %353 = vsyncpa [#allocation6], 1 }
 0x119   :  { %354 = vsyncpa [#allocation4], 1 }
 0x11a   :  { %356 = vsyncpa [#allocation4 + $0x1], 1 }

</bundles_post_ra>
